<compile_context>
chip_gen: v7x
topology: tpu7x:2x2x1
jax: 0.10.0
libtpu: 0.0.40
codegen_flags: <defaults>
</compile_context>

<pallas_src>
import functools
import numpy as np
import jax
import jax.numpy as jnp
from jax import lax
from jax.experimental import pallas as pl
from jax.experimental.pallas import tpu as pltpu

# ---------------- configuration (mirrors FlashDiffusion defaults, small) ----
T_TRAIN = 100                        # teacher_denoiser.timesteps (synthetic)
K_LIST = [8, 8, 8, 8]                # small K for the demo (module default 32;
                                     # K > 16 takes the fori_loop path below)
NUM_IT_PER_K = [5000, 5000, 5000, 5000]
DISTILL_SCALE = [1.0, 1.0, 1.0, 1.0]
DMD_SCALE = [0.0, 0.3, 0.5, 0.7]
GUIDANCE_MIN, GUIDANCE_MAX = 3.0, 13.0
MIX_COMPONENTS = 4
MIX_VAR = 0.5
MODE_PROBS = [[0.0, 0.0, 0.5, 0.5],
              [0.1, 0.3, 0.3, 0.3],
              [0.25, 0.25, 0.25, 0.25],
              [0.4, 0.2, 0.2, 0.2]]
SIGMA_DATA = 0.5

# noise schedule (linear betas) -> sqrt_alpha_cumprod / sigmas buffers
_betas = np.linspace(1e-4, 0.02, T_TRAIN, dtype=np.float64)
_alphas_cumprod = np.cumprod(1.0 - _betas)
_sqrt_acp_np = np.sqrt(_alphas_cumprod).astype(np.float32)
_sigmas_np = np.sqrt(1.0 - _alphas_cumprod).astype(np.float32)
SQRT_ACP = jnp.asarray(_sqrt_acp_np)
SIGMAS = jnp.asarray(_sigmas_np)

_VMEM = pltpu.MemorySpace.VMEM
_SMEM = pltpu.MemorySpace.SMEM


# =========================== fused Pallas kernel ============================

def _flash_kernel(scal_ref, bsc_ref,
                  z_ref, noise_ref, noise2_ref,
                  ws_eff_ref, mroll_ref, wsd_ref, wtd_ref,
                  pdmd_ref, bias_s_ref, bias_tr_ref, bias_td_ref,
                  xn_ref, so_ref, to_ref, distill_ref, dmd_ref,
                  *, batch, chans):
    """Fused FlashDiffusion step on (B*C, HW)-packed tensors.

    scal_ref : SMEM (4,)  = [a_noise, b_noise, k1, k2]  where
               k1 = c_skip + c_out/alpha, k2 = c_out*sigma/alpha at start_t.
    bsc_ref  : SMEM (K,)  per-rollout-step bias scale (c2, 0 for padded rows).
    ws_eff   : VMEM (BC,BC) tmod0-folded block-diag student weight.
    mroll    : VMEM (K,BC,BC) per-step rollout matrices (identity-padded).
    wsd/wtd  : VMEM (BC,BC) tmod_dmd-folded block-diag student/teacher weights.
    pdmd     : VMEM (4,BC,HW) lane-dense DMD per-batch coefficients
               [alpha, sigma, 1/alpha, sigma/alpha].
    bias_*   : VMEM (BC,HW) lane-dense conditioning biases (guidance folded).
    """
    f32 = jnp.float32
    z = z_ref[...]
    nz = noise_ref[...]
    bias_s = bias_s_ref[...]

    # ---------------- student branch ----------------
    xn = scal_ref[0] * z + scal_ref[1] * nz                     # noisy_sample_init
    eps_s = jnp.dot(ws_eff_ref[...], xn, preferred_element_type=f32) + bias_s
    so = scal_ref[2] * xn - scal_ref[3] * eps_s                 # boundary combine
    xn_ref[...] = xn
    so_ref[...] = so

    # ------------- teacher rollout: static K steps (identity padded) --------
    bias_tr = bias_tr_ref[...]
    n_steps = mroll_ref.shape[0]
    x = xn
    if n_steps <= 16:
        for s in range(n_steps):                                # static unroll
            x = (jnp.dot(mroll_ref[s], x, preferred_element_type=f32)
                 + bsc_ref[s] * bias_tr)
    else:
        def _step(s, xc):                                       # K = 32 path
            return (jnp.dot(mroll_ref[s], xc, preferred_element_type=f32)
                    + bsc_ref[s] * bias_tr)
        x = lax.fori_loop(0, n_steps, _step, x, unroll=2)
    to_ref[...] = x

    # ---------------- distill L2 sum ----------------
    d = so - x
    distill_ref[...] = jnp.sum(jnp.sum(d * d, axis=1, keepdims=True),
                               axis=0, keepdims=True)

    # ---------------- DMD chain + sum(delta^2) ----------------
    a_sl = pdmd_ref[0]
    b_sl = pdmd_ref[1]
    ia_sl = pdmd_ref[2]
    sa_sl = pdmd_ref[3]
    xnd = a_sl * so + b_sl * noise2_ref[...]                    # add_noise
    eps_fake = jnp.dot(wsd_ref[...], xnd, preferred_element_type=f32) + bias_s
    eps_real = (jnp.dot(wtd_ref[...], xnd, preferred_element_type=f32)
                + bias_td_ref[...])
    coeff = sa_sl * (eps_real - eps_fake)                       # (real-fake)*sig/alpha
    pred0 = ia_sl * xnd - sa_sl * eps_real                      # predicted x_0
    coef_sq = coeff * coeff
    absd = jnp.abs(so - pred0)

    hw = z.shape[1]
    inv_cnt = 1.0 / (chans * hw)
    acc = jnp.zeros((1, 1), f32)
    for b in range(batch):                                      # tiny static loop
        r0 = b * chans
        c2b = jnp.sum(jnp.sum(coef_sq[r0:r0 + chans, :], axis=1, keepdims=True),
                      axis=0, keepdims=True)
        madb = jnp.sum(jnp.sum(absd[r0:r0 + chans, :], axis=1, keepdims=True),
                       axis=0, keepdims=True) * inv_cnt
        wb = 1.0 / (madb + 1e-5)                                # per-batch weight
        acc = acc + wb * wb * c2b
    dmd_ref[...] = acc


def _build_flash_call(B, C, HW, K):
    BC = B * C
    kern = functools.partial(_flash_kernel, batch=B, chans=C)
    vm = pl.BlockSpec(memory_space=_VMEM)
    sm = pl.BlockSpec(memory_space=_SMEM)
    # NOTE(v7x): at these sizes everything is whole-array VMEM blocks (<0.2 MiB
    # total). If HW scales to real latent sizes, tile HW (512-1024 lanes) via
    # BlockSpecs, add a "parallel" grid axis, and set vmem_limit_bytes.
    return pl.pallas_call(
        kern,
        out_shape=(
            jax.ShapeDtypeStruct((BC, HW), jnp.float32),   # noisy_sample_init
            jax.ShapeDtypeStruct((BC, HW), jnp.float32),   # student_output
            jax.ShapeDtypeStruct((BC, HW), jnp.float32),   # teacher_output
            jax.ShapeDtypeStruct((1, 1), jnp.float32),     # sum((so-to)^2)
            jax.ShapeDtypeStruct((1, 1), jnp.float32),     # sum(delta^2) (DMD)
        ),
        in_specs=[sm, sm] + [vm] * 11,
        out_specs=(vm, vm, vm, vm, vm),
    )


# =========================== FlashDiffusion wrapper =========================

class FlashDiffusionPallas:
    """Synthetic FlashDiffusion with tiny linear (1x1-conv-like) denoisers."""

    def __init__(self, key, C=4, Dc=8):
        k1, k2, k3, k4 = jax.random.split(key, 4)
        eye = jnp.eye(C, dtype=jnp.float32)
        self.W_student = eye + 0.2 * jax.random.normal(k1, (C, C), jnp.float32)
        self.V_student = 0.1 * jax.random.normal(k2, (C, Dc), jnp.float32)
        self.W_teacher = eye + 0.2 * jax.random.normal(k3, (C, C), jnp.float32)
        self.V_teacher = 0.1 * jax.random.normal(k4, (C, Dc), jnp.float32)
        self.iter_steps = 0
        self.K_steps = np.cumsum(NUM_IT_PER_K)
        self._step_cache = {}

    # ---- scheduler helpers (host-side, static per K_step) ----
    @staticmethod
    def _set_timesteps_trailing(K):
        step_ratio = T_TRAIN / K
        ts = np.round(np.arange(T_TRAIN, 0, -step_ratio)).astype(np.int64) - 1
        return ts[:K]

    @staticmethod
    def _mixture_prob(K, K_step):
        locs = [i * (K // MIX_COMPONENTS) for i in range(MIX_COMPONENTS)]
        mode_probs = MODE_PROBS[K_step]
        p = np.array([sum(w * np.exp(-(i - l) ** 2 / (2.0 * MIX_VAR))
                          for w, l in zip(mode_probs, locs)) for i in range(K)])
        return p / p.sum()

    @staticmethod
    def _scalings_for_boundary_conditions(t, sigma_data=SIGMA_DATA):
        c_skip = sigma_data ** 2 / ((t / 0.1) ** 2 + sigma_data ** 2)
        c_out = (t / 0.1) / ((t / 0.1) ** 2 + sigma_data ** 2) ** 0.5
        return c_skip, c_out

    def _build_tables(self, K_step):
        """Static per-K_step lookup tables (host, numpy)."""
        K = K_LIST[K_step]
        ts = self._set_timesteps_trailing(K)
        prob = self._mixture_prob(K, K_step)
        # student table per start_idx: [a_noise, b_noise, k1, k2, tmod0]
        rows = []
        for idx in range(K):
            t = int(ts[idx])
            alpha = float(_sqrt_acp_np[t])
            sigma = float(_sigmas_np[t])
            # init_noise_sigma == 1.0 when sampling starts at the first step
            a_noise, b_noise = (0.0, 1.0) if idx == 0 else (alpha, sigma)
            c_skip, c_out = self._scalings_for_boundary_conditions(float(t))
            rows.append([a_noise, b_noise,
                         c_skip + c_out / alpha,            # k1
                         c_out * sigma / alpha,             # k2
                         1.0 + t / T_TRAIN * 0.1])          # tmod0
        stud = np.asarray(rows, np.float32)
        # full rollout schedule (step s: ts[s] -> ts[s+1]); DDIM fold coeffs
        c1 = np.empty(K, np.float32)
        c2 = np.empty(K, np.float32)
        tmods = np.empty(K, np.float32)
        for s in range(K):
            t = int(ts[s])
            alpha_t = float(_sqrt_acp_np[t])
            sigma_t = float(_sigmas_np[t])
            if s + 1 < K:
                tp = int(ts[s + 1])
                alpha_p = float(_sqrt_acp_np[tp])
                sigma_p = float(_sigmas_np[tp])
            else:
                alpha_p, sigma_p = 1.0, 0.0
            tmods[s] = 1.0 + t / T_TRAIN * 0.1
            c1[s] = alpha_p / alpha_t
            c2[s] = sigma_p - alpha_p * sigma_t / alpha_t
        return dict(ts=ts.astype(np.int32), logp=np.log(prob).astype(np.float32),
                    stud=stud, c1=c1, c2=c2, tmods=tmods)

    # ---- build one jitted device step per (K_step, shapes) ----
    def _get_step_fn(self, K_step, B, C, H, W):
        cache_key = (K_step, B, C, H, W)
        if cache_key in self._step_cache:
            return self._step_cache[cache_key]

        K = K_LIST[K_step]
        HW = H * W
        BC = B * C
        tab = self._build_tables(K_step)
        ts_arr = jnp.asarray(tab['ts'])
        logp = jnp.asarray(tab['logp'])
        stud_table = jnp.asarray(tab['stud'])
        c1 = jnp.asarray(tab['c1'])
        c2 = jnp.asarray(tab['c2'])
        tmods = jnp.asarray(tab['tmods'])

        W_s, W_t = self.W_student, self.W_teacher
        V_s, V_t = self.V_student, self.V_teacher
        eye_B = jnp.eye(B, dtype=jnp.float32)
        eye_BC = jnp.eye(BC, dtype=jnp.float32)
        Wbig_s = jnp.kron(eye_B, W_s)                           # (BC, BC)
        Wbig_t = jnp.kron(eye_B, W_t)
        # per-step folded rollout matrices: M_s = c1*I + c2*tmod*W_teacher
        Mfull = (c1[:, None, None] * eye_BC[None]
                 + (c2 * tmods)[:, None, None] * Wbig_t[None])  # (K, BC, BC)

        dscale = float(DISTILL_SCALE[K_step])
        dmdscale = float(DMD_SCALE[K_step])
        flash = _build_flash_call(B, C, HW, K)

        @jax.jit
        def step(x_start, cond, key):
            z = x_start.reshape(BC, HW).astype(jnp.float32)     # (B*C, HW) packing
            cond2 = cond.reshape(B, -1).astype(jnp.float32)
            kidx, kn, kg, kdn, kdt, kdg = jax.random.split(key, 6)

            # ---- timestep sampling (torch.multinomial analogue, on-device) ----
            start_idx = jax.random.categorical(kidx, logp)      # int32 scalar
            srow = stud_table[start_idx]                        # (5,)
            scal = srow[:4]                                     # SMEM scalars
            ws_eff = srow[4] * Wbig_s                           # tmod0 folded

            # mask rollout so it effectively starts at start_idx (shape-stable)
            keep = jnp.arange(K) >= start_idx
            mroll = jnp.where(keep[:, None, None], Mfull, eye_BC[None])
            bsc = jnp.where(keep, c2, 0.0)                      # (K,)

            noise = jax.random.normal(kn, (BC, HW), jnp.float32)
            noise2 = jax.random.normal(kdn, (BC, HW), jnp.float32)

            # conditioning biases (unconditional_prob = 0 -> never dropped),
            # guidance folded in, pre-broadcast lane-dense
            bias_s_vec = (cond2 @ V_s.T).reshape(BC)
            bias_t_vec = (cond2 @ V_t.T).reshape(BC)
            g1 = (jax.random.uniform(kg, ()) * (GUIDANCE_MAX - GUIDANCE_MIN)
                  + GUIDANCE_MIN)
            g2 = (jax.random.uniform(kdg, ()) * (GUIDANCE_MAX - GUIDANCE_MIN)
                  + GUIDANCE_MIN)
            bias_s = jnp.broadcast_to(bias_s_vec[:, None], (BC, HW))
            bias_tr = jnp.broadcast_to((g1 * bias_t_vec)[:, None], (BC, HW))
            bias_td = jnp.broadcast_to((g2 * bias_t_vec)[:, None], (BC, HW))

            # DMD per-batch coefficients: lane-dense slabs + tmod-folded weights
            t_dmd = jax.random.randint(kdt, (B,), 0, T_TRAIN)
            a_d = SQRT_ACP[t_dmd]
            s_d = SIGMAS[t_dmd]
            cols = jnp.stack([a_d, s_d, 1.0 / a_d, s_d / a_d], axis=0)   # (4, B)
            pdmd = jnp.broadcast_to(
                jnp.repeat(cols, C, axis=1)[:, :, None], (4, BC, HW))
            tmod_d = 1.0 + t_dmd.astype(jnp.float32) / T_TRAIN * 0.1
            wsd = jnp.kron(jnp.diag(tmod_d), W_s)
            wtd = jnp.kron(jnp.diag(tmod_d), W_t)

            xn, so, to, dsum, msum = flash(
                scal, bsc, z, noise, noise2, ws_eff, mroll, wsd, wtd,
                pdmd, bias_s, bias_tr, bias_td)

            denom = jnp.float32(B * C * HW)
            distill_loss = dsum[0, 0] / denom
            dmd_loss = msum[0, 0] / denom
            loss = distill_loss * dscale + dmd_loss * dmdscale

            return {
                'loss_dict': {
                    'gen_total': loss,
                    'gen_distill': distill_loss * dscale,
                    'gen_dmd': dmdscale * dmd_loss,
                },
                'teacher_output': lax.stop_gradient(to).reshape(B, C, H, W),
                'student_output': so.reshape(B, C, H, W),
                'noisy_sample': xn.reshape(B, C, H, W),
                'start_timestep': ts_arr[start_idx],
            }

        self._step_cache[cache_key] = step
        return step

    # ---- forward ----
    def forward(self, x_start, cond, key, train_stage='generator'):
        self.iter_steps += 1
        B, C, H, W = x_start.shape
        if self.iter_steps > self.K_steps[-1]:
            K_step = len(K_LIST) - 1
        else:
            K_step = int(np.argmax(self.iter_steps < self.K_steps))
        step_fn = self._get_step_fn(K_step, B, C, H, W)
        out = step_fn(x_start, cond, key)
        # discriminator is None -> adversarial branch disabled (module default)
        if train_stage != 'generator':
            out = dict(out)
            out['loss_dict'] = {'gen_total': out['loss_dict']['gen_total']}
        return out


# =========================== demo ===========================================

if __name__ == "__main__":
    key = jax.random.PRNGKey(0)
    kp, kx, kc, kf = jax.random.split(key, 4)
    B, C, H, W, Dc = 2, 4, 16, 16, 8

    model = FlashDiffusionPallas(kp, C=C, Dc=Dc)
    x_start = jax.random.normal(kx, (B, C, H, W), jnp.float32)
    cond = jax.random.normal(kc, (B, Dc), jnp.float32)

    out = model.forward(x_start, cond, kf, train_stage='generator')
    jax.block_until_ready(out['loss_dict']['gen_total'])
    jax.block_until_ready(out['student_output'])
    jax.block_until_ready(out['teacher_output'])
    jax.block_until_ready(out['noisy_sample'])
    print("KERNEL_OK")
</pallas_src>

<mosaic_0001>
module attributes {stable_mosaic.version = 11 : i64} {
  func.func @_flash_kernel(%arg0: memref<4xf32, #tpu.memory_space<smem>>, %arg1: memref<8xf32, #tpu.memory_space<smem>>, %arg2: memref<8x256xf32, #tpu.memory_space<vmem>>, %arg3: memref<8x256xf32, #tpu.memory_space<vmem>>, %arg4: memref<8x256xf32, #tpu.memory_space<vmem>>, %arg5: memref<8x8xf32, #tpu.memory_space<vmem>>, %arg6: memref<8x8x8xf32, #tpu.memory_space<vmem>>, %arg7: memref<8x8xf32, #tpu.memory_space<vmem>>, %arg8: memref<8x8xf32, #tpu.memory_space<vmem>>, %arg9: memref<4x8x256xf32, #tpu.memory_space<vmem>>, %arg10: memref<8x256xf32, #tpu.memory_space<vmem>>, %arg11: memref<8x256xf32, #tpu.memory_space<vmem>>, %arg12: memref<8x256xf32, #tpu.memory_space<vmem>>, %arg13: memref<8x256xf32, #tpu.memory_space<vmem>>, %arg14: memref<8x256xf32, #tpu.memory_space<vmem>>, %arg15: memref<8x256xf32, #tpu.memory_space<vmem>>, %arg16: memref<1x1xf32, #tpu.memory_space<vmem>>, %arg17: memref<1x1xf32, #tpu.memory_space<vmem>>) attributes {dimension_semantics = [], scalar_prefetch = 0 : i64, scratch_operands = 0 : i64, tpu.core_type = #tpu.core_type<tc>} {
    %c0 = arith.constant 0 : index
    %c0_0 = arith.constant 0 : index
    %0 = vector.load %arg2[%c0, %c0_0] : memref<8x256xf32, #tpu.memory_space<vmem>>, vector<8x256xf32>
    %c0_1 = arith.constant 0 : index
    %c0_2 = arith.constant 0 : index
    %1 = vector.load %arg3[%c0_1, %c0_2] : memref<8x256xf32, #tpu.memory_space<vmem>>, vector<8x256xf32>
    %c0_3 = arith.constant 0 : index
    %c0_4 = arith.constant 0 : index
    %2 = vector.load %arg10[%c0_3, %c0_4] : memref<8x256xf32, #tpu.memory_space<vmem>>, vector<8x256xf32>
    %c0_5 = arith.constant 0 : index
    %3 = memref.load %arg0[%c0_5] : memref<4xf32, #tpu.memory_space<smem>>
    %4 = vector.broadcast %3 : f32 to vector<8x256xf32>
    %5 = arith.mulf %4, %0 : vector<8x256xf32>
    %c1 = arith.constant 1 : index
    %6 = memref.load %arg0[%c1] : memref<4xf32, #tpu.memory_space<smem>>
    %7 = vector.broadcast %6 : f32 to vector<8x256xf32>
    %8 = arith.mulf %7, %1 : vector<8x256xf32>
    %9 = arith.addf %5, %8 : vector<8x256xf32>
    %c0_6 = arith.constant 0 : index
    %c0_7 = arith.constant 0 : index
    %10 = vector.load %arg5[%c0_6, %c0_7] : memref<8x8xf32, #tpu.memory_space<vmem>>, vector<8x8xf32>
    %cst = arith.constant dense<0.000000e+00> : vector<8x256xf32>
    %11 = tpu.matmul %10, %9, %cst {dimension_numbers = #tpu.dot_dimension_numbers<[1], [0], [0], [1], [0, 0, 1, 1], [], []>} : vector<8x8xf32>, vector<8x256xf32>, vector<8x256xf32> -> vector<8x256xf32>
    %12 = arith.addf %11, %2 : vector<8x256xf32>
    %c2 = arith.constant 2 : index
    %13 = memref.load %arg0[%c2] : memref<4xf32, #tpu.memory_space<smem>>
    %14 = vector.broadcast %13 : f32 to vector<8x256xf32>
    %15 = arith.mulf %14, %9 : vector<8x256xf32>
    %c3 = arith.constant 3 : index
    %16 = memref.load %arg0[%c3] : memref<4xf32, #tpu.memory_space<smem>>
    %17 = vector.broadcast %16 : f32 to vector<8x256xf32>
    %18 = arith.mulf %17, %12 : vector<8x256xf32>
    %19 = arith.subf %15, %18 : vector<8x256xf32>
    %c0_8 = arith.constant 0 : index
    %c0_9 = arith.constant 0 : index
    %20 = vector.load %arg13[%c0_8, %c0_9] : memref<8x256xf32, #tpu.memory_space<vmem>>, vector<8x256xf32>
    tpu.vector_store %arg13[%c0_8, %c0_9], %9 {strides = array<i32>} : memref<8x256xf32, #tpu.memory_space<vmem>>, vector<8x256xf32>,
    %c0_10 = arith.constant 0 : index
    %c0_11 = arith.constant 0 : index
    %21 = vector.load %arg14[%c0_10, %c0_11] : memref<8x256xf32, #tpu.memory_space<vmem>>, vector<8x256xf32>
    tpu.vector_store %arg14[%c0_10, %c0_11], %19 {strides = array<i32>} : memref<8x256xf32, #tpu.memory_space<vmem>>, vector<8x256xf32>,
    %c0_12 = arith.constant 0 : index
    %c0_13 = arith.constant 0 : index
    %22 = vector.load %arg11[%c0_12, %c0_13] : memref<8x256xf32, #tpu.memory_space<vmem>>, vector<8x256xf32>
    %c0_14 = arith.constant 0 : index
    %c0_15 = arith.constant 0 : index
    %c0_16 = arith.constant 0 : index
    %23 = vector.load %arg6[%c0_14, %c0_15, %c0_16] : memref<8x8x8xf32, #tpu.memory_space<vmem>>, vector<1x8x8xf32>
    %24 = vector.shape_cast %23 : vector<1x8x8xf32> to vector<8x8xf32>
    %cst_17 = arith.constant dense<0.000000e+00> : vector<8x256xf32>
    %25 = tpu.matmul %24, %9, %cst_17 {dimension_numbers = #tpu.dot_dimension_numbers<[1], [0], [0], [1], [0, 0, 1, 1], [], []>} : vector<8x8xf32>, vector<8x256xf32>, vector<8x256xf32> -> vector<8x256xf32>
    %c0_18 = arith.constant 0 : index
    %26 = memref.load %arg1[%c0_18] : memref<8xf32, #tpu.memory_space<smem>>
    %27 = vector.broadcast %26 : f32 to vector<8x256xf32>
    %28 = arith.mulf %27, %22 : vector<8x256xf32>
    %29 = arith.addf %25, %28 : vector<8x256xf32>
    %c1_19 = arith.constant 1 : index
    %c0_20 = arith.constant 0 : index
    %c0_21 = arith.constant 0 : index
    %30 = vector.load %arg6[%c1_19, %c0_20, %c0_21] : memref<8x8x8xf32, #tpu.memory_space<vmem>>, vector<1x8x8xf32>
    %31 = vector.shape_cast %30 : vector<1x8x8xf32> to vector<8x8xf32>
    %cst_22 = arith.constant dense<0.000000e+00> : vector<8x256xf32>
    %32 = tpu.matmul %31, %29, %cst_22 {dimension_numbers = #tpu.dot_dimension_numbers<[1], [0], [0], [1], [0, 0, 1, 1], [], []>} : vector<8x8xf32>, vector<8x256xf32>, vector<8x256xf32> -> vector<8x256xf32>
    %c1_23 = arith.constant 1 : index
    %33 = memref.load %arg1[%c1_23] : memref<8xf32, #tpu.memory_space<smem>>
    %34 = vector.broadcast %33 : f32 to vector<8x256xf32>
    %35 = arith.mulf %34, %22 : vector<8x256xf32>
    %36 = arith.addf %32, %35 : vector<8x256xf32>
    %c2_24 = arith.constant 2 : index
    %c0_25 = arith.constant 0 : index
    %c0_26 = arith.constant 0 : index
    %37 = vector.load %arg6[%c2_24, %c0_25, %c0_26] : memref<8x8x8xf32, #tpu.memory_space<vmem>>, vector<1x8x8xf32>
    %38 = vector.shape_cast %37 : vector<1x8x8xf32> to vector<8x8xf32>
    %cst_27 = arith.constant dense<0.000000e+00> : vector<8x256xf32>
    %39 = tpu.matmul %38, %36, %cst_27 {dimension_numbers = #tpu.dot_dimension_numbers<[1], [0], [0], [1], [0, 0, 1, 1], [], []>} : vector<8x8xf32>, vector<8x256xf32>, vector<8x256xf32> -> vector<8x256xf32>
    %c2_28 = arith.constant 2 : index
    %40 = memref.load %arg1[%c2_28] : memref<8xf32, #tpu.memory_space<smem>>
    %41 = vector.broadcast %40 : f32 to vector<8x256xf32>
    %42 = arith.mulf %41, %22 : vector<8x256xf32>
    %43 = arith.addf %39, %42 : vector<8x256xf32>
    %c3_29 = arith.constant 3 : index
    %c0_30 = arith.constant 0 : index
    %c0_31 = arith.constant 0 : index
    %44 = vector.load %arg6[%c3_29, %c0_30, %c0_31] : memref<8x8x8xf32, #tpu.memory_space<vmem>>, vector<1x8x8xf32>
    %45 = vector.shape_cast %44 : vector<1x8x8xf32> to vector<8x8xf32>
    %cst_32 = arith.constant dense<0.000000e+00> : vector<8x256xf32>
    %46 = tpu.matmul %45, %43, %cst_32 {dimension_numbers = #tpu.dot_dimension_numbers<[1], [0], [0], [1], [0, 0, 1, 1], [], []>} : vector<8x8xf32>, vector<8x256xf32>, vector<8x256xf32> -> vector<8x256xf32>
    %c3_33 = arith.constant 3 : index
    %47 = memref.load %arg1[%c3_33] : memref<8xf32, #tpu.memory_space<smem>>
    %48 = vector.broadcast %47 : f32 to vector<8x256xf32>
    %49 = arith.mulf %48, %22 : vector<8x256xf32>
    %50 = arith.addf %46, %49 : vector<8x256xf32>
    %c4 = arith.constant 4 : index
    %c0_34 = arith.constant 0 : index
    %c0_35 = arith.constant 0 : index
    %51 = vector.load %arg6[%c4, %c0_34, %c0_35] : memref<8x8x8xf32, #tpu.memory_space<vmem>>, vector<1x8x8xf32>
    %52 = vector.shape_cast %51 : vector<1x8x8xf32> to vector<8x8xf32>
    %cst_36 = arith.constant dense<0.000000e+00> : vector<8x256xf32>
    %53 = tpu.matmul %52, %50, %cst_36 {dimension_numbers = #tpu.dot_dimension_numbers<[1], [0], [0], [1], [0, 0, 1, 1], [], []>} : vector<8x8xf32>, vector<8x256xf32>, vector<8x256xf32> -> vector<8x256xf32>
    %c4_37 = arith.constant 4 : index
    %54 = memref.load %arg1[%c4_37] : memref<8xf32, #tpu.memory_space<smem>>
    %55 = vector.broadcast %54 : f32 to vector<8x256xf32>
    %56 = arith.mulf %55, %22 : vector<8x256xf32>
    %57 = arith.addf %53, %56 : vector<8x256xf32>
    %c5 = arith.constant 5 : index
    %c0_38 = arith.constant 0 : index
    %c0_39 = arith.constant 0 : index
    %58 = vector.load %arg6[%c5, %c0_38, %c0_39] : memref<8x8x8xf32, #tpu.memory_space<vmem>>, vector<1x8x8xf32>
    %59 = vector.shape_cast %58 : vector<1x8x8xf32> to vector<8x8xf32>
    %cst_40 = arith.constant dense<0.000000e+00> : vector<8x256xf32>
    %60 = tpu.matmul %59, %57, %cst_40 {dimension_numbers = #tpu.dot_dimension_numbers<[1], [0], [0], [1], [0, 0, 1, 1], [], []>} : vector<8x8xf32>, vector<8x256xf32>, vector<8x256xf32> -> vector<8x256xf32>
    %c5_41 = arith.constant 5 : index
    %61 = memref.load %arg1[%c5_41] : memref<8xf32, #tpu.memory_space<smem>>
    %62 = vector.broadcast %61 : f32 to vector<8x256xf32>
    %63 = arith.mulf %62, %22 : vector<8x256xf32>
    %64 = arith.addf %60, %63 : vector<8x256xf32>
    %c6 = arith.constant 6 : index
    %c0_42 = arith.constant 0 : index
    %c0_43 = arith.constant 0 : index
    %65 = vector.load %arg6[%c6, %c0_42, %c0_43] : memref<8x8x8xf32, #tpu.memory_space<vmem>>, vector<1x8x8xf32>
    %66 = vector.shape_cast %65 : vector<1x8x8xf32> to vector<8x8xf32>
    %cst_44 = arith.constant dense<0.000000e+00> : vector<8x256xf32>
    %67 = tpu.matmul %66, %64, %cst_44 {dimension_numbers = #tpu.dot_dimension_numbers<[1], [0], [0], [1], [0, 0, 1, 1], [], []>} : vector<8x8xf32>, vector<8x256xf32>, vector<8x256xf32> -> vector<8x256xf32>
    %c6_45 = arith.constant 6 : index
    %68 = memref.load %arg1[%c6_45] : memref<8xf32, #tpu.memory_space<smem>>
    %69 = vector.broadcast %68 : f32 to vector<8x256xf32>
    %70 = arith.mulf %69, %22 : vector<8x256xf32>
    %71 = arith.addf %67, %70 : vector<8x256xf32>
    %c7 = arith.constant 7 : index
    %c0_46 = arith.constant 0 : index
    %c0_47 = arith.constant 0 : index
    %72 = vector.load %arg6[%c7, %c0_46, %c0_47] : memref<8x8x8xf32, #tpu.memory_space<vmem>>, vector<1x8x8xf32>
    %73 = vector.shape_cast %72 : vector<1x8x8xf32> to vector<8x8xf32>
    %cst_48 = arith.constant dense<0.000000e+00> : vector<8x256xf32>
    %74 = tpu.matmul %73, %71, %cst_48 {dimension_numbers = #tpu.dot_dimension_numbers<[1], [0], [0], [1], [0, 0, 1, 1], [], []>} : vector<8x8xf32>, vector<8x256xf32>, vector<8x256xf32> -> vector<8x256xf32>
    %c7_49 = arith.constant 7 : index
    %75 = memref.load %arg1[%c7_49] : memref<8xf32, #tpu.memory_space<smem>>
    %76 = vector.broadcast %75 : f32 to vector<8x256xf32>
    %77 = arith.mulf %76, %22 : vector<8x256xf32>
    %78 = arith.addf %74, %77 : vector<8x256xf32>
    %c0_50 = arith.constant 0 : index
    %c0_51 = arith.constant 0 : index
    %79 = vector.load %arg15[%c0_50, %c0_51] : memref<8x256xf32, #tpu.memory_space<vmem>>, vector<8x256xf32>
    tpu.vector_store %arg15[%c0_50, %c0_51], %78 {strides = array<i32>} : memref<8x256xf32, #tpu.memory_space<vmem>>, vector<8x256xf32>,
    %80 = arith.subf %19, %78 : vector<8x256xf32>
    %81 = arith.mulf %80, %80 : vector<8x256xf32>
    %cst_52 = arith.constant dense<0.000000e+00> : vector<8xf32>
    %82 = vector.multi_reduction <add>, %81, %cst_52 [1] : vector<8x256xf32> to vector<8xf32>
    %83 = vector.shape_cast %82 : vector<8xf32> to vector<8x1xf32>
    %cst_53 = arith.constant dense<0.000000e+00> : vector<1xf32>
    %84 = vector.multi_reduction <add>, %83, %cst_53 [0] : vector<8x1xf32> to vector<1xf32>
    %85 = vector.shape_cast %84 : vector<1xf32> to vector<1x1xf32>
    %c0_54 = arith.constant 0 : index
    %c0_55 = arith.constant 0 : index
    %86 = vector.load %arg16[%c0_54, %c0_55] : memref<1x1xf32, #tpu.memory_space<vmem>>, vector<1x1xf32>
    tpu.vector_store %arg16[%c0_54, %c0_55], %85 {strides = array<i32>} : memref<1x1xf32, #tpu.memory_space<vmem>>, vector<1x1xf32>,
    %c0_56 = arith.constant 0 : index
    %c0_57 = arith.constant 0 : index
    %c0_58 = arith.constant 0 : index
    %87 = vector.load %arg9[%c0_56, %c0_57, %c0_58] : memref<4x8x256xf32, #tpu.memory_space<vmem>>, vector<1x8x256xf32>
    %88 = vector.shape_cast %87 : vector<1x8x256xf32> to vector<8x256xf32>
    %c1_59 = arith.constant 1 : index
    %c0_60 = arith.constant 0 : index
    %c0_61 = arith.constant 0 : index
    %89 = vector.load %arg9[%c1_59, %c0_60, %c0_61] : memref<4x8x256xf32, #tpu.memory_space<vmem>>, vector<1x8x256xf32>
    %90 = vector.shape_cast %89 : vector<1x8x256xf32> to vector<8x256xf32>
    %c2_62 = arith.constant 2 : index
    %c0_63 = arith.constant 0 : index
    %c0_64 = arith.constant 0 : index
    %91 = vector.load %arg9[%c2_62, %c0_63, %c0_64] : memref<4x8x256xf32, #tpu.memory_space<vmem>>, vector<1x8x256xf32>
    %92 = vector.shape_cast %91 : vector<1x8x256xf32> to vector<8x256xf32>
    %c3_65 = arith.constant 3 : index
    %c0_66 = arith.constant 0 : index
    %c0_67 = arith.constant 0 : index
    %93 = vector.load %arg9[%c3_65, %c0_66, %c0_67] : memref<4x8x256xf32, #tpu.memory_space<vmem>>, vector<1x8x256xf32>
    %94 = vector.shape_cast %93 : vector<1x8x256xf32> to vector<8x256xf32>
    %95 = arith.mulf %88, %19 : vector<8x256xf32>
    %c0_68 = arith.constant 0 : index
    %c0_69 = arith.constant 0 : index
    %96 = vector.load %arg4[%c0_68, %c0_69] : memref<8x256xf32, #tpu.memory_space<vmem>>, vector<8x256xf32>
    %97 = arith.mulf %90, %96 : vector<8x256xf32>
    %98 = arith.addf %95, %97 : vector<8x256xf32>
    %c0_70 = arith.constant 0 : index
    %c0_71 = arith.constant 0 : index
    %99 = vector.load %arg7[%c0_70, %c0_71] : memref<8x8xf32, #tpu.memory_space<vmem>>, vector<8x8xf32>
    %cst_72 = arith.constant dense<0.000000e+00> : vector<8x256xf32>
    %100 = tpu.matmul %99, %98, %cst_72 {dimension_numbers = #tpu.dot_dimension_numbers<[1], [0], [0], [1], [0, 0, 1, 1], [], []>} : vector<8x8xf32>, vector<8x256xf32>, vector<8x256xf32> -> vector<8x256xf32>
    %101 = arith.addf %100, %2 : vector<8x256xf32>
    %c0_73 = arith.constant 0 : index
    %c0_74 = arith.constant 0 : index
    %102 = vector.load %arg8[%c0_73, %c0_74] : memref<8x8xf32, #tpu.memory_space<vmem>>, vector<8x8xf32>
    %cst_75 = arith.constant dense<0.000000e+00> : vector<8x256xf32>
    %103 = tpu.matmul %102, %98, %cst_75 {dimension_numbers = #tpu.dot_dimension_numbers<[1], [0], [0], [1], [0, 0, 1, 1], [], []>} : vector<8x8xf32>, vector<8x256xf32>, vector<8x256xf32> -> vector<8x256xf32>
    %c0_76 = arith.constant 0 : index
    %c0_77 = arith.constant 0 : index
    %104 = vector.load %arg12[%c0_76, %c0_77] : memref<8x256xf32, #tpu.memory_space<vmem>>, vector<8x256xf32>
    %105 = arith.addf %103, %104 : vector<8x256xf32>
    %106 = arith.subf %105, %101 : vector<8x256xf32>
    %107 = arith.mulf %94, %106 : vector<8x256xf32>
    %108 = arith.mulf %92, %98 : vector<8x256xf32>
    %109 = arith.mulf %94, %105 : vector<8x256xf32>
    %110 = arith.subf %108, %109 : vector<8x256xf32>
    %111 = arith.mulf %107, %107 : vector<8x256xf32>
    %112 = arith.subf %19, %110 : vector<8x256xf32>
    %113 = math.absf %112 : vector<8x256xf32>
    %cst_78 = arith.constant 0.000000e+00 : f32
    %114 = vector.broadcast %cst_78 : f32 to vector<1x1xf32>
    %115 = vector.extract_strided_slice %111 {offsets = [0, 0], sizes = [4, 256], strides = [1, 1]} : vector<8x256xf32> to vector<4x256xf32>
    %cst_79 = arith.constant dense<0.000000e+00> : vector<4xf32>
    %116 = vector.multi_reduction <add>, %115, %cst_79 [1] : vector<4x256xf32> to vector<4xf32>
    %117 = vector.shape_cast %116 : vector<4xf32> to vector<4x1xf32>
    %cst_80 = arith.constant dense<0.000000e+00> : vector<1xf32>
    %118 = vector.multi_reduction <add>, %117, %cst_80 [0] : vector<4x1xf32> to vector<1xf32>
    %119 = vector.shape_cast %118 : vector<1xf32> to vector<1x1xf32>
    %120 = vector.extract_strided_slice %113 {offsets = [0, 0], sizes = [4, 256], strides = [1, 1]} : vector<8x256xf32> to vector<4x256xf32>
    %cst_81 = arith.constant dense<0.000000e+00> : vector<4xf32>
    %121 = vector.multi_reduction <add>, %120, %cst_81 [1] : vector<4x256xf32> to vector<4xf32>
    %122 = vector.shape_cast %121 : vector<4xf32> to vector<4x1xf32>
    %cst_82 = arith.constant dense<0.000000e+00> : vector<1xf32>
    %123 = vector.multi_reduction <add>, %122, %cst_82 [0] : vector<4x1xf32> to vector<1xf32>
    %124 = vector.shape_cast %123 : vector<1xf32> to vector<1x1xf32>
    %cst_83 = arith.constant 9.765625E-4 : f32
    %125 = vector.broadcast %cst_83 : f32 to vector<1x1xf32>
    %126 = arith.mulf %124, %125 : vector<1x1xf32>
    %cst_84 = arith.constant 9.99999974E-6 : f32
    %127 = vector.broadcast %cst_84 : f32 to vector<1x1xf32>
    %128 = arith.addf %126, %127 : vector<1x1xf32>
    %cst_85 = arith.constant 1.000000e+00 : f32
    %129 = vector.broadcast %cst_85 : f32 to vector<1x1xf32>
    %130 = arith.divf %129, %128 : vector<1x1xf32>
    %131 = arith.mulf %130, %130 : vector<1x1xf32>
    %132 = arith.mulf %131, %119 : vector<1x1xf32>
    %133 = arith.addf %114, %132 : vector<1x1xf32>
    %134 = vector.extract_strided_slice %111 {offsets = [4, 0], sizes = [4, 256], strides = [1, 1]} : vector<8x256xf32> to vector<4x256xf32>
    %cst_86 = arith.constant dense<0.000000e+00> : vector<4xf32>
    %135 = vector.multi_reduction <add>, %134, %cst_86 [1] : vector<4x256xf32> to vector<4xf32>
    %136 = vector.shape_cast %135 : vector<4xf32> to vector<4x1xf32>
    %cst_87 = arith.constant dense<0.000000e+00> : vector<1xf32>
    %137 = vector.multi_reduction <add>, %136, %cst_87 [0] : vector<4x1xf32> to vector<1xf32>
    %138 = vector.shape_cast %137 : vector<1xf32> to vector<1x1xf32>
    %139 = vector.extract_strided_slice %113 {offsets = [4, 0], sizes = [4, 256], strides = [1, 1]} : vector<8x256xf32> to vector<4x256xf32>
    %cst_88 = arith.constant dense<0.000000e+00> : vector<4xf32>
    %140 = vector.multi_reduction <add>, %139, %cst_88 [1] : vector<4x256xf32> to vector<4xf32>
    %141 = vector.shape_cast %140 : vector<4xf32> to vector<4x1xf32>
    %cst_89 = arith.constant dense<0.000000e+00> : vector<1xf32>
    %142 = vector.multi_reduction <add>, %141, %cst_89 [0] : vector<4x1xf32> to vector<1xf32>
    %143 = vector.shape_cast %142 : vector<1xf32> to vector<1x1xf32>
    %cst_90 = arith.constant 9.765625E-4 : f32
    %144 = vector.broadcast %cst_90 : f32 to vector<1x1xf32>
    %145 = arith.mulf %143, %144 : vector<1x1xf32>
    %cst_91 = arith.constant 9.99999974E-6 : f32
    %146 = vector.broadcast %cst_91 : f32 to vector<1x1xf32>
    %147 = arith.addf %145, %146 : vector<1x1xf32>
    %cst_92 = arith.constant 1.000000e+00 : f32
    %148 = vector.broadcast %cst_92 : f32 to vector<1x1xf32>
    %149 = arith.divf %148, %147 : vector<1x1xf32>
    %150 = arith.mulf %149, %149 : vector<1x1xf32>
    %151 = arith.mulf %150, %138 : vector<1x1xf32>
    %152 = arith.addf %133, %151 : vector<1x1xf32>
    %c0_93 = arith.constant 0 : index
    %c0_94 = arith.constant 0 : index
    %153 = vector.load %arg17[%c0_93, %c0_94] : memref<1x1xf32, #tpu.memory_space<vmem>>, vector<1x1xf32>
    tpu.vector_store %arg17[%c0_93, %c0_94], %152 {strides = array<i32>} : memref<1x1xf32, #tpu.memory_space<vmem>>, vector<1x1xf32>,
    return
  }
}

</mosaic_0001>

<bundles_post_ra>
// kernel: step.1
= control target key start
LH: loop header
LB: loop body
LE: loop exit
PB: predicated region body
PF: predicated region fallthrough
CT: control target
= control target key end

     0   :  { %s1571_s0 = inlined_call_operand.vmem [shape: f32[4], index: 0, kind: input, shape index: {}]   ;;  %s1572_s1 = inlined_call_operand.vmem [shape: f32[8], index: 1, kind: input, shape index: {}]   ;;  %s1573_s2 = inlined_call_operand.vmem [shape: f32[8,256], index: 2, kind: input, shape index: {}]   ;;  %s1574_s3 = inlined_call_operand.vmem [shape: f32[8,256], index: 3, kind: input, shape index: {}]   ;;  %s1575_s4 = inlined_call_operand.vmem [shape: f32[8,256], index: 4, kind: input, shape index: {}]   ;;  %s1576_s5 = inlined_call_operand.vmem [shape: f32[8,8], index: 5, kind: input, shape index: {}]   ;;  %s1577_s6 = inlined_call_operand.vmem [shape: f32[8,8,8], index: 6, kind: input, shape index: {}]   ;;  %s1578_s7 = inlined_call_operand.vmem [shape: f32[8,8], index: 7, kind: input, shape index: {}]   ;;  %s1579_s8 = inlined_call_operand.vmem [shape: f32[8,8], index: 8, kind: input, shape index: {}]   ;;  %s1580_s9 = inlined_call_operand.vmem [shape: f32[4,8,256], index: 9, kind: input, shape index: {}]   ;;  %s1581_s10 = inlined_call_operand.vmem [shape: f32[8,256], index: 10, kind: input, shape index: {}]   ;;  %s1582_s11 = inlined_call_operand.vmem [shape: f32[8,256], index: 11, kind: input, shape index: {}]   ;;  %s1583_s12 = inlined_call_operand.vmem [shape: f32[8,256], index: 12, kind: input, shape index: {}]   ;;  %s1584_s13 = inlined_call_operand.vmem [shape: f32[8,256], index: 13, kind: output, shape index: {0}]   ;;  %s1585_s14 = inlined_call_operand.vmem [shape: f32[8,256], index: 14, kind: output, shape index: {1}]   ;;  %s1586_s15 = inlined_call_operand.vmem [shape: f32[8,256], index: 15, kind: output, shape index: {2}]   ;;  %s1587_s16 = inlined_call_operand.hbm [shape: f32[1,1], index: 16, kind: output, shape index: {3}]   ;;  %s1588_s17 = inlined_call_operand.hbm [shape: f32[1,1], index: 17, kind: output, shape index: {4}]  }
   0x1   :  { %1589 = sst [smem:[#allocation14_spill]] %s1571_s0 }
   0x2   :  { %1590 = sst [smem:[#allocation15_spill]] %s1572_s1 }
   0x3   :  { %23 = vsyncpa [#allocation4], 0 }
   0x4   :  { %24 = vsyncpa [#allocation6], 0 }
   0x5   :  { %25 = vsyncpa [#allocation3], 0 }
   0x6   :  { %26 = vsyncpa [#allocation9], 0  ;;  %s1591_s26 = sld [smem:[#allocation14_spill]]  ;;  %s1592_s0 = sld [smem:[#allocation15_spill]] }
   0xc   :  { %s33_s27 = sshll.u32 %s1591_s26, 4  ;;  %s43_s30 = sshll.u32 %s1592_s0, 4  ;;  %s34_s27 = int_to_ptr.vmem [resolvable:$true] %s33_s27  ;;  %s44_s30 = int_to_ptr.vmem [resolvable:$true] %s43_s30 }
   0xd   :  { %s1183_s18 = scalar_lea.vmem %s34_s27, 16  ;;  %p1188_p1 = scmp.lt.s32.totalorder %s34_s27, %s34_s27 }
   0xe   :  { %p1184_p0 = scmp.ne.s32.totalorder %s34_s27, %s1183_s18  ;;  %p1189_p2 = scmp.lt.s32.totalorder %s1183_s18, %s1183_s18 }
  0x10   :  { %p1190_p3 = por %p1189_p2, %p1188_p1 }
  0x12   :  { %p1191_p4 = pnand %p1190_p3, %p1184_p0 }
  0x14   :  { %1194 = shalt.err (!%p1191_p4)
}
  0x15   :  { %s1259_s19 = smov [#allocation2]   ;;  %s1195_s1 = scalar_lea.vmem %s44_s30, 16 }
  0x16   :  { %36 = dma.vmem_to_smem %s34_s27, 16, %s1259_s19, [#allocation4]  }
  0x17   :  { %p1196_p5 = scmp.ne.s32.totalorder %s44_s30, %s1195_s1  ;;  %p1200_p6 = scmp.lt.s32.totalorder %s44_s30, %s44_s30 }
  0x18   :  { %p1201_p7 = scmp.lt.s32.totalorder %s1195_s1, %s1195_s1 }
  0x1a   :  { %p1202_p8 = por %p1201_p7, %p1200_p6 }
  0x1c   :  { %p1203_p9 = pnand %p1202_p8, %p1196_p5 }
  0x1e   :  { %1206 = shalt.err (!%p1203_p9)
}
  0x1f   :  { %s1260_s20 = smov [#allocation5]  }
  0x20   :  { %46 = dma.vmem_to_smem %s44_s30, 16, %s1260_s20, [#allocation6]  }
  0x21   :  { %1251 = dma.done.wait [#allocation4], 16  }
  0x22   :  { %1252 = vsyncadd [#allocation4], 4294967280 }
  0x23   :  { %1253 = dma.done.wait [#allocation6], 16  }
  0x24   :  { %1254 = vsyncadd [#allocation6], 4294967280 }
  0x25   :  { %75 = sfence }
  0x26   :  { %s82_s21 = sld [smem:[#allocation2]]  ;;  %s1140_s22 = sld [smem:[#allocation2 + $0x1]]  ;;  %v1261_v0 = vmov 0.0   ;;  %v77_v1 = vld [vmem:[%s1573_s2 + $0x8] sm:$0xff]  ;;  %v76_v3 = vld [vmem:[%s1573_s2] sm:$0xff]  ;;  %vm93_vm0 = vcmask 64512  }
  0x27   :  { %256 = vmatprep.mubr.f32.mxu1 %v1261_v0  ;;  %161 = vmatprep.mubr.f32.mxu0 %v1261_v0  ;;  %v79_v2 = vld [vmem:[%s1574_s3 + $0x8] sm:$0xff]  ;;  %v78_v4 = vld [vmem:[%s1574_s3] sm:$0xff]  ;;  %s1143_s27 = sld [smem:[#allocation2 + $0x3]]  ;;  %s1146_s2 = sld [smem:[#allocation5 + $0x1]]  ;;  %v1148_v46 = vld [vmem:[%s1577_s6 + $0x10] sm:$0xff]  ;;  %vm1059_vm1 = vcmask 1047556  }
  0x28   :  { %v184_v13 = vld [vmem:[%s1577_s6] sm:$0xff]  ;;  %v1393_v16 = vld [vmem:[%s1582_s11 + $0x8] sm:$0xff]  ;;  %v1151_v54 = vld [vmem:[%s1577_s6 + $0x18] sm:$0xff]  ;;  %s1152_s23 = sld [smem:[#allocation5 + $0x3]]  ;;  %s1155_s25 = sld [smem:[#allocation5 + $0x4]]  ;;  %vm1027_vm2 = vcmask 1043456  }
  0x29   :  { %v92_v14 = vld [vmem:[%s1576_s5] sm:$0xff]  ;;  %v1145_v24 = vld [vmem:[%s1577_s6 + $0x8] sm:$0xff]  ;;  %s1164_s5 = sld [smem:[#allocation5 + $0x7]]  ;;  %vm838_vm3 = vcmask 0  }
  0x2a   :  { %v1398_v17 = vld [vmem:[%s1582_s11] sm:$0xff]  ;;  %s1142_s11 = sld [smem:[#allocation2 + $0x2]]  ;;  %v1415_v27 = vld [vmem:[%s1581_s10 + $0x8] sm:$0xff] }
  0x2b   :  { %v1410_v25 = vld [vmem:[%s1581_s10] sm:$0xff] }
  0x2c   :  { %v83_v5 = vstv %s82_s21  ;;  %v87_v6 = vstv %s1140_s22  ;;  %s185_s22 = sld [smem:[#allocation5]]  ;;  %v1154_v62 = vld [vmem:[%s1577_s6 + $0x20] sm:$0xff] }
  0x2d   :  { %v85_v7 = vmul.f32 %v83_v5, %v77_v1  ;;  %v89_v8 = vmul.f32 %v87_v6, %v79_v2  ;;  %v84_v9 = vmul.f32 %v83_v5, %v76_v3  ;;  %v88_v10 = vmul.f32 %v87_v6, %v78_v4 }
  0x2e   :  { %v173_v29 = vstv %s1143_s27  ;;  %v266_v39 = vstv %s1146_s2  ;;  %v426_v55 = vstv %s1152_s23  ;;  %v506_v63 = vstv %s1155_s25  ;;  %s1161_s23 = sld [smem:[#allocation5 + $0x6]] }
  0x2f   :  { %v91_v11 = vadd.f32 %v89_v8, %v85_v7  ;;  %v90_v12 = vadd.f32 %v88_v10, %v84_v9  ;;  %v268_v40 = vmul.f32 %v266_v39, %v1393_v16  ;;  %v267_v41 = vmul.f32 %v266_v39, %v1398_v17  ;;  %v1157_v7 = vld [vmem:[%s1577_s6 + $0x28] sm:$0xff]  ;;  %v1167_v10 = vld [vmem:[%s1580_s9 + $0x18] sm:$0xff] }
  0x30   :  { %v169_v26 = vstv %s1142_s11  ;;  %v428_v56 = vmul.f32 %v426_v55, %v1393_v16  ;;  %v427_v57 = vmul.f32 %v426_v55, %v1398_v17  ;;  %v508_v1 = vmul.f32 %v506_v63, %v1393_v16  ;;  %s1158_s11 = sld [smem:[#allocation5 + $0x5]]  ;;  %v841_v9 = vld [vmem:[%s1580_s9 + $0x8] sm:$0xff]  ;;  %v1168_v55 = vld [vmem:[%s1580_s9 + $0x20] sm:$0xff] }
  0x31   :  { %179 = vst [vmem:[%s1584_s13 + $0x8] sm:$0xff] %v91_v11  ;;  %192 = vmatprep.subr.mxu1 %v91_v11  ;;  %178 = vst [vmem:[%s1584_s13] sm:$0xff] %v90_v12  ;;  %97 = vmatprep.subr.mxu0 %v91_v11  ;;  %v170_v31 = vmul.f32 %v169_v26, %v90_v12  ;;  %v171_v34 = vmul.f32 %v169_v26, %v91_v11  ;;  %v854_v11 = vld [vmem:[%s1575_s4 + $0x8] sm:$0xff] }
  0x32   :  { %193 = vmatpush1.msra.mxu1 %v90_v12  ;;  %98 = vmatpush1.msra.mxu0 %v90_v12  ;;  %v186_v15 = vstv %s185_s22  ;;  %v507_v2 = vmul.f32 %v506_v63, %v1398_v17 }
  0x33   :  { %1144 = vmatmul.mubr.msk.f32.vlgmr.msra.gmra.mrb[0].mxu1 %vm93_vm0, %v184_v13  ;;  %1141 = vmatmul.mubr.msk.f32.vlgmr.msra.gmra.mrb[0].mxu0 %vm93_vm0, %v92_v14  ;;  %v188_v18 = vmul.f32 %v186_v15, %v1393_v16  ;;  %v187_v19 = vmul.f32 %v186_v15, %v1398_v17  ;;  %v840_v13 = vld [vmem:[%s1580_s9] sm:$0xff]  ;;  %v1166_v14 = vld [vmem:[%s1580_s9 + $0x10] sm:$0xff] }
  0x34   :  { %416 = vmatprep.mubr.f32.mxu1 %v1261_v0  ;;  %336 = vmatprep.mubr.f32.mxu0 %v1261_v0  ;;  %v853_v15 = vld [vmem:[%s1575_s4] sm:$0xff] }
  0x36   :  { %v586_v8 = vstv %s1158_s11 }
  0x37   :  { %v588_v12 = vmul.f32 %v586_v8, %v1393_v16 }
 0x106   :  { %v258_v20 = vpop.f32.mrb[0].mxu1  ;;  %v163_v28 = vpop.f32.mrb[0].mxu0 }
 0x107   :  { %v260_v21 = vpop.f32.mrb[1].mxu1  ;;  %v259_v23 = vadd.f32 %v258_v20, %v187_v19  ;;  %v164_v30 = vadd.f32 %v163_v28, %v1410_v25  ;;  %v165_v32 = vpop.f32.mrb[1].mxu0 }
 0x108   :  { %v261_v22 = vadd.f32 %v260_v21, %v188_v18  ;;  %v166_v33 = vadd.f32 %v165_v32, %v1415_v27  ;;  %v587_v18 = vmul.f32 %v586_v8, %v1398_v17  ;;  %v856_v21 = vmul.f32 %v1167_v10, %v854_v11  ;;  %v859_v32 = vld [vmem:[%s1578_s7] sm:$0xff] }
 0x109   :  { %v174_v35 = vmul.f32 %v173_v29, %v164_v30 }
 0x10a   :  { %272 = vmatprep.subr.mxu0 %v261_v22  ;;  %v175_v36 = vmul.f32 %v173_v29, %v166_v33  ;;  %v1160_v29 = vld [vmem:[%s1577_s6 + $0x30] sm:$0xff]  ;;  %v666_v33 = vstv %s1161_s23 }
 0x10b   :  { %273 = vmatpush1.msra.mxu0 %v259_v23  ;;  %v1419_v37 = vsub.f32 %v170_v31, %v174_v35  ;;  %v667_v35 = vmul.f32 %v666_v33, %v1398_v17 }
 0x10c   :  { %1147 = vmatmul.mubr.msk.f32.vlgmr.msra.gmra.mrb[2].mxu0 %vm93_vm0, %v1145_v24  ;;  %v1421_v38 = vsub.f32 %v171_v34, %v175_v36  ;;  %v855_v24 = vmul.f32 %v1166_v14, %v853_v15  ;;  %v668_v34 = vmul.f32 %v666_v33, %v1393_v16 }
 0x10d   :  { %496 = vmatprep.mubr.f32.mxu0 %v1261_v0  ;;  %180 = vst [vmem:[%s1585_s14] sm:$0xff] %v1419_v37  ;;  %v851_v23 = vmul.f32 %v840_v13, %v1419_v37 }
 0x10e   :  { %181 = vst [vmem:[%s1585_s14 + $0x8] sm:$0xff] %v1421_v38  ;;  %s1149_s14 = sld [smem:[#allocation5 + $0x2]]  ;;  %v852_v20 = vmul.f32 %v841_v9, %v1421_v38 }
 0x10f   :  { %v857_v31 = vadd.f32 %v855_v24, %v851_v23 }
 0x110   :  { %v858_v30 = vadd.f32 %v856_v21, %v852_v20 }
 0x114   :  { %v346_v47 = vstv %s1149_s14 }
 0x115   :  { %v348_v48 = vmul.f32 %v346_v47, %v1393_v16  ;;  %v347_v49 = vmul.f32 %v346_v47, %v1398_v17 }
 0x1df   :  { %v338_v42 = vpop.f32.mrb[2].mxu0 }
 0x1e0   :  { %v340_v43 = vpop.f32.mrb[3].mxu0  ;;  %v339_v45 = vadd.f32 %v338_v42, %v267_v41  ;;  %v1163_v42 = vld [vmem:[%s1577_s6 + $0x38] sm:$0xff] }
 0x1e1   :  { %v341_v44 = vadd.f32 %v340_v43, %v268_v40  ;;  %v934_v43 = vld [vmem:[%s1579_s8] sm:$0xff] }
 0x1e3   :  { %352 = vmatprep.subr.mxu1 %v341_v44 }
 0x1e4   :  { %353 = vmatpush1.msra.mxu1 %v339_v45 }
 0x1e5   :  { %1150 = vmatmul.mubr.msk.f32.vlgmr.msra.gmra.mrb[2].mxu1 %vm93_vm0, %v1148_v46  ;;  %v746_v46 = vstv %s1164_s5 }
 0x1e6   :  { %576 = vmatprep.mubr.f32.mxu1 %v1261_v0  ;;  %v747_v47 = vmul.f32 %v746_v46, %v1398_v17 }
 0x2b8   :  { %v418_v50 = vpop.f32.mrb[2].mxu1 }
 0x2b9   :  { %v420_v51 = vpop.f32.mrb[3].mxu1  ;;  %v419_v53 = vadd.f32 %v418_v50, %v347_v49 }
 0x2ba   :  { %v421_v52 = vadd.f32 %v420_v51, %v348_v48  ;;  %v748_v48 = vmul.f32 %v746_v46, %v1393_v16  ;;  %v936_v16 = vld [vmem:[%s1583_s12 + $0x8] sm:$0xff] }
 0x2bc   :  { %432 = vmatprep.subr.mxu0 %v421_v52 }
 0x2bd   :  { %433 = vmatpush1.msra.mxu0 %v419_v53 }
 0x2be   :  { %1153 = vmatmul.mubr.msk.f32.vlgmr.msra.gmra.mrb[4].mxu0 %vm93_vm0, %v1151_v54 }
 0x2bf   :  { %656 = vmatprep.mubr.f32.mxu0 %v1261_v0 }
 0x391   :  { %v498_v58 = vpop.f32.mrb[4].mxu0 }
 0x392   :  { %v500_v59 = vpop.f32.mrb[5].mxu0  ;;  %v499_v61 = vadd.f32 %v498_v58, %v427_v57 }
 0x393   :  { %v501_v60 = vadd.f32 %v500_v59, %v428_v56  ;;  %v1170_v56 = vld [vmem:[%s1580_s9 + $0x30] sm:$0xff] }
 0x395   :  { %512 = vmatprep.subr.mxu1 %v501_v60  ;;  %v1169_v60 = vld [vmem:[%s1580_s9 + $0x28] sm:$0xff] }
 0x396   :  { %513 = vmatpush1.msra.mxu1 %v499_v61  ;;  %v1171_v61 = vld [vmem:[%s1580_s9 + $0x38] sm:$0xff]  ;;  %s1262_s9 = smov [#allocation7]  }
 0x397   :  { %1156 = vmatmul.mubr.msk.f32.vlgmr.msra.gmra.mrb[4].mxu1 %vm93_vm0, %v1154_v62  ;;  %s1110_s3 = sshll.u32 %s1262_s9, 4  ;;  %s1111_s3 = int_to_ptr.vmem [resolvable:$true] %s1110_s3 }
 0x398   :  { %736 = vmatprep.mubr.f32.mxu1 %v1261_v0  ;;  %s1207_s20 = scalar_lea.vmem %s1111_s3, 16  ;;  %s1211_s14 = scalar_lea.vmem %s1111_s3, 32 }
 0x399   :  { %p1208_p10 = scmp.ne.s32.totalorder %s1111_s3, %s1207_s20  ;;  %p1212_p11 = scmp.lt.s32.totalorder %s1111_s3, %s1111_s3 }
 0x39a   :  { %p1213_p12 = scmp.lt.s32.totalorder %s1211_s14, %s1207_s20 }
 0x39c   :  { %p1214_p13 = por %p1213_p12, %p1212_p11 }
 0x39e   :  { %p1215_p0 = pnand %p1214_p13, %p1208_p10 }
 0x46a   :  { %v578_v3 = vpop.f32.mrb[4].mxu1 }
 0x46b   :  { %v580_v4 = vpop.f32.mrb[5].mxu1  ;;  %v579_v6 = vadd.f32 %v578_v3, %v507_v2  ;;  %v1015_v3 = vmul.f32 %v1168_v55, %v857_v31 }
 0x46c   :  { %v581_v5 = vadd.f32 %v580_v4, %v508_v1 }
 0x46e   :  { %592 = vmatprep.subr.mxu0 %v581_v5 }
 0x46f   :  { %593 = vmatpush1.msra.mxu0 %v579_v6  ;;  %v1016_v6 = vmul.f32 %v1169_v60, %v858_v30 }
 0x470   :  { %1159 = vmatmul.mubr.msk.f32.vlgmr.msra.gmra.mrb[6].mxu0 %vm93_vm0, %v1157_v7 }
 0x471   :  { %816 = vmatprep.mubr.f32.mxu0 %v1261_v0 }
 0x543   :  { %v658_v19 = vpop.f32.mrb[6].mxu0 }
 0x544   :  { %v660_v22 = vpop.f32.mrb[7].mxu0  ;;  %v659_v28 = vadd.f32 %v658_v19, %v587_v18 }
 0x545   :  { %v661_v26 = vadd.f32 %v660_v22, %v588_v12 }
 0x547   :  { %672 = vmatprep.subr.mxu1 %v661_v26 }
 0x548   :  { %673 = vmatpush1.msra.mxu1 %v659_v28 }
 0x549   :  { %1162 = vmatmul.mubr.msk.f32.vlgmr.msra.gmra.mrb[6].mxu1 %vm93_vm0, %v1160_v29  ;;  %863 = vmatprep.subr.mxu1 %v858_v30 }
 0x54a   :  { %864 = vmatpush1.msra.mxu1 %v857_v31  ;;  %927 = vmatprep.mubr.f32.mxu1 %v1261_v0 }
 0x54d   :  { %1172 = vmatmul.mubr.msk.f32.vlgmr.msra.gmra.mrb[8].mxu1 %vm93_vm0, %v859_v32 }
 0x61c   :  { %v738_v36 = vpop.f32.mrb[6].mxu1 }
 0x61d   :  { %v740_v39 = vpop.f32.mrb[7].mxu1  ;;  %v739_v41 = vadd.f32 %v738_v36, %v667_v35 }
 0x61e   :  { %v741_v40 = vadd.f32 %v740_v39, %v668_v34 }
 0x620   :  { %752 = vmatprep.subr.mxu0 %v741_v40  ;;  %v929_v44 = vpop.f32.mrb[8].mxu1 }
 0x621   :  { %753 = vmatpush1.msra.mxu0 %v739_v41  ;;  %v931_v45 = vpop.f32.mrb[9].mxu1  ;;  %v930_v54 = vadd.f32 %v929_v44, %v1410_v25 }
 0x622   :  { %1165 = vmatmul.mubr.msk.f32.vlgmr.msra.gmra.mrb[8].mxu0 %vm93_vm0, %v1163_v42  ;;  %940 = vmatprep.subr.mxu0 %v858_v30  ;;  %v932_v25 = vadd.f32 %v931_v45, %v1415_v27 }
 0x623   :  { %941 = vmatpush1.msra.mxu0 %v857_v31  ;;  %1004 = vmatprep.mubr.f32.mxu0 %v1261_v0  ;;  %v935_v0 = vld [vmem:[%s1583_s12] sm:$0xff] }
 0x626   :  { %1173 = vmatmul.mubr.msk.f32.vlgmr.msra.gmra.mrb[10].mxu0 %vm93_vm0, %v934_v43 }
 0x6f5   :  { %v818_v49 = vpop.f32.mrb[8].mxu0 }
 0x6f6   :  { %v819_v50 = vadd.f32 %v818_v49, %v747_v47  ;;  %v820_v51 = vpop.f32.mrb[9].mxu0 }
 0x6f7   :  { %v821_v52 = vadd.f32 %v820_v51, %v748_v48 }
 0x6f8   :  { %823 = vst [vmem:[%s1586_s15] sm:$0xff] %v819_v50  ;;  %v825_v53 = vsub.f32 %v1419_v37, %v819_v50 }
 0x6f9   :  { %824 = vst [vmem:[%s1586_s15 + $0x8] sm:$0xff] %v821_v52  ;;  %v826_v17 = vsub.f32 %v1421_v38, %v821_v52  ;;  %v1006_v57 = vpop.f32.mrb[10].mxu0 }
 0x6fa   :  { %v827_v58 = vmul.f32 %v825_v53, %v825_v53  ;;  %v1007_v59 = vadd.f32 %v1006_v57, %v935_v0  ;;  %v1008_v62 = vpop.f32.mrb[11].mxu0 }
 0x6fb   :  { %v828_v63 = vmul.f32 %v826_v17, %v826_v17  ;;  %v1009_v1 = vadd.f32 %v1008_v62, %v936_v16 }
 0x6fc   :  { %v1011_v2 = vsub.f32 %v1007_v59, %v930_v54  ;;  %v1017_v4 = vmul.f32 %v1170_v56, %v1007_v59 }
 0x6fd   :  { %v1012_v5 = vsub.f32 %v1009_v1, %v932_v25  ;;  %v1018_v7 = vmul.f32 %v1171_v61, %v1009_v1  ;;  %v829_v27 = vadd.f32 %v828_v63, %v827_v58 }
 0x6fe   :  { %v1019_v8 = vsub.f32 %v1015_v3, %v1017_v4  ;;  %v1013_v9 = vmul.f32 %v1170_v56, %v1011_v2 }
 0x6ff   :  { %v1020_v10 = vsub.f32 %v1016_v6, %v1018_v7  ;;  %v1014_v11 = vmul.f32 %v1171_v61, %v1012_v5 }
 0x700   :  { %v1021_v12 = vmul.f32 %v1013_v9, %v1013_v9  ;;  %v1023_v13 = vsub.f32 %v1419_v37, %v1019_v8 }
 0x701   :  { %v1022_v14 = vmul.f32 %v1014_v11, %v1014_v11  ;;  %v1024_v15 = vsub.f32 %v1421_v38, %v1020_v10 }
 0x702   :  { %v1060_v18 = vsel %vm1059_vm1, %v1021_v12, 0.0  ;;  %v1025_v19 = vand.u32 2147483647, %v1023_v13  ;;  %v1028_v20 = vsel %vm1027_vm2, %v1021_v12, 0.0 }
 0x703   :  { %v1061_v21 = vsel %vm1059_vm1, %v1022_v14, 0.0  ;;  %v1026_v22 = vand.u32 2147483647, %v1024_v15  ;;  %v1029_v23 = vsel %vm1027_vm2, %v1022_v14, 0.0 }
 0x704   :  { %v1062_v24 = vadd.f32 %v1061_v21, %v1060_v18  ;;  %v1075_v26 = vsel %vm1059_vm1, %v1025_v19, 0.0  ;;  %v1030_v28 = vadd.f32 %v1029_v23, %v1028_v20  ;;  %v1040_v29 = vsel %vm1027_vm2, %v1025_v19, 0.0 }
 0x705   :  { %v1076_v37 = vsel %vm1059_vm1, %v1026_v22, 0.0  ;;  %v1041_v38 = vsel %vm1027_vm2, %v1026_v22, 0.0 }
 0x706   :  { %1063 = vadd.xlane.f32.xlu1 %v1062_v24  ;;  %v1077_v30 = vadd.f32 %v1076_v37, %v1075_v26  ;;  %v1042_v31 = vadd.f32 %v1041_v38, %v1040_v29 }
 0x708   :  { %1078 = vadd.xlane.f32.xlu0 %v1077_v30 }
 0x70a   :  { %1031 = vadd.xlane.f32.xlu1 %v1030_v28 }
 0x70c   :  { %1043 = vadd.xlane.f32.xlu0 %v1042_v31 }
 0x710   :  { %830 = vadd.xlane.f32.xlu0 %v829_v27 }
 0x793   :  { %v1064_v33 = vpop.xlane.xlu1 %1063 }
 0x794   :  { %v1066_v41 = vrot.slane %v1064_v33, 4 }
 0x795   :  { %v1079_v32 = vpop.xlane.xlu0 %1078 }
 0x796   :  { %v1081_v34 = vrot.slane %v1079_v32, 4  ;;  %v1068_v49 = vsel %vm1027_vm2, %v1066_v41, 0.0 }
 0x797   :  { %v1032_v44 = vpop.xlane.xlu1 %1031  ;;  %v1069_v16 = vrot.slane %v1068_v49, 4 }
 0x798   :  { %v1083_v35 = vsel %vm1027_vm2, %v1081_v34, 0.0  ;;  %v1033_v51 = vsel %vm1027_vm2, %v1032_v44, 0.0 }
 0x799   :  { %v1084_v36 = vrot.slane %v1083_v35, 4  ;;  %v1044_v39 = vpop.xlane.xlu0 %1043  ;;  %v1034_v17 = vrot.slane %v1033_v51, 4  ;;  %v1070_v60 = vadd.f32 %v1069_v16, %v1068_v49 }
 0x79a   :  { %v1045_v40 = vsel %vm1027_vm2, %v1044_v39, 0.0 }
 0x79b   :  { %v1085_v42 = vadd.f32 %v1084_v36, %v1083_v35  ;;  %v1046_v43 = vrot.slane %v1045_v40, 4  ;;  %v1035_v61 = vadd.f32 %v1034_v17, %v1033_v51  ;;  %v1071_v4 = vrot.slane %v1070_v60, 2 }
 0x79d   :  { %v1086_v45 = vrot.slane %v1085_v42, 2  ;;  %v1047_v46 = vadd.f32 %v1046_v43, %v1045_v40  ;;  %v831_v47 = vpop.xlane.xlu0 %830  ;;  %v1036_v5 = vrot.slane %v1035_v61, 2 }
 0x79e   :  { %v832_v48 = vrot.slane %v831_v47, 4 }
 0x79f   :  { %v1087_v50 = vadd.f32 %v1086_v45, %v1085_v42  ;;  %v1048_v52 = vrot.slane %v1047_v46, 2 }
 0x7a0   :  { %v833_v0 = vadd.f32 %v832_v48, %v831_v47 }
 0x7a1   :  { %v1088_v53 = vrot.slane %v1087_v50, 1  ;;  %v1049_v54 = vadd.f32 %v1048_v52, %v1047_v46 }
 0x7a2   :  { %v834_v55 = vrot.slane %v833_v0, 2 }
 0x7a3   :  { %v1089_v56 = vadd.f32 %v1088_v53, %v1087_v50  ;;  %v1050_v57 = vrot.slane %v1049_v54, 1 }
 0x7a4   :  { %v835_v25 = vadd.f32 %v834_v55, %v833_v0 }
 0x7a5   :  { %v1090_v58 = vmul.f32 0.0009765625, %v1089_v56  ;;  %v1051_v59 = vadd.f32 %v1050_v57, %v1049_v54 }
 0x7a6   :  { %v836_v62 = vrot.slane %v835_v25, 1 }
 0x7a7   :  { %v1091_v63 = vadd.f32 1e-05, %v1090_v58  ;;  %v1052_v1 = vmul.f32 0.0009765625, %v1051_v59 }
 0x7a8   :  { %v837_v2 = vadd.f32 %v836_v62, %v835_v25 }
 0x7a9   :  { %1179 = vrcp.f32 %v1091_v63  ;;  %v1053_v3 = vadd.f32 1e-05, %v1052_v1 }
 0x7aa   :  { %839 = vst.msk [vmem:[#allocation7] sm:$0x1] %vm838_vm3, %v837_v2 }
 0x7ab   :  { %1181 = vrcp.f32 %v1053_v3 }
 0x7ac   :  { %1218 = shalt.err (!%p1215_p0)
}
 0x7ad   :  { %s1219_s22 = scalar_lea.hbm %s1587_s16, 16 }
 0x7ae   :  { %p1220_p1 = scmp.ne.s32.totalorder %s1587_s16, %s1219_s22  ;;  %p1223_p2 = scmp.lt.u32.totalorder %s1219_s22, %s1587_s16 }
 0x7b0   :  { %p1225_p3 = pnand %p1223_p2, %p1220_p1 }
 0x7b2   :  { %1228 = shalt.err (!%p1225_p3)
}
 0x7b3   :  { %1113 = dma.vmem_to_hbm [thread:$0]  %s1111_s3, 16, %s1587_s16, [#allocation3]   ;;  %v1072_v6 = vadd.f32 %v1071_v4, %v1070_v60  ;;  %v1037_v7 = vadd.f32 %v1036_v5, %v1035_v61  ;;  %v1180_v9 = vpop.eup %1179 }
 0x7b4   :  { %v1094_v10 = vmul.f32 %v1180_v9, %v1180_v9  ;;  %s1263_s6 = smov [#allocation8]  }
 0x7b5   :  { %v1073_v27 = vrot.slane %v1072_v6, 1  ;;  %v1038_v8 = vrot.slane %v1037_v7, 1  ;;  %v1182_v11 = vpop.eup %1181  ;;  %s1120_s26 = sshll.u32 %s1263_s6, 4  ;;  %s1121_s26 = int_to_ptr.vmem [resolvable:$true] %s1120_s26 }
 0x7b6   :  { %v1056_v13 = vmul.f32 %v1182_v11, %v1182_v11  ;;  %s1229_s11 = scalar_lea.vmem %s1121_s26, 16  ;;  %s1233_s16 = scalar_lea.vmem %s1121_s26, 32 }
 0x7b7   :  { %v1039_v12 = vadd.f32 %v1038_v8, %v1037_v7  ;;  %v1074_v14 = vadd.f32 %v1073_v27, %v1072_v6  ;;  %p1230_p4 = scmp.ne.s32.totalorder %s1121_s26, %s1229_s11  ;;  %p1234_p5 = scmp.lt.s32.totalorder %s1121_s26, %s1121_s26 }
 0x7b8   :  { %p1235_p6 = scmp.lt.s32.totalorder %s1233_s16, %s1229_s11 }
 0x7b9   :  { %v1057_v15 = vmul.f32 %v1056_v13, %v1039_v12  ;;  %v1095_v18 = vmul.f32 %v1094_v10, %v1074_v14 }
 0x7ba   :  { %p1236_p7 = por %p1235_p6, %p1234_p5 }
 0x7bb   :  { %v1096_v19 = vadd.f32 %v1095_v18, %v1057_v15 }
 0x7bc   :  { %p1237_p8 = pnand %p1236_p7, %p1230_p4 }
 0x7bd   :  { %1097 = vst.msk [vmem:[#allocation8] sm:$0x1] %vm838_vm3, %v1096_v19 }
 0x7be   :  { %1240 = shalt.err (!%p1237_p8)
}
 0x7bf   :  { %s1241_s28 = scalar_lea.hbm %s1588_s17, 16 }
 0x7c0   :  { %p1242_p9 = scmp.ne.s32.totalorder %s1588_s17, %s1241_s28  ;;  %p1245_p10 = scmp.lt.u32.totalorder %s1241_s28, %s1588_s17 }
 0x7c2   :  { %p1247_p11 = pnand %p1245_p10, %p1242_p9 }
 0x7c4   :  { %1250 = shalt.err (!%p1247_p11)
}
 0x7c5   :  { %1123 = dma.vmem_to_hbm [thread:$0]  %s1121_s26, 16, %s1588_s17, [#allocation9]  }
 0x7c6   :  { %1255 = dma.done.wait [#allocation3], 16  }
 0x7c7   :  { %1256 = vsyncadd [#allocation3], 4294967280 }
 0x7c8   :  { %1257 = dma.done.wait [#allocation9], 16  }
 0x7c9   :  { %1258 = vsyncadd [#allocation9], 4294967280 }
 0x7ca   :  { %1136 = vsyncpa [#allocation3], 1 }
 0x7cb   :  { %1137 = vsyncpa [#allocation9], 1 }
 0x7cc   :  { %1138 = vsyncpa [#allocation4], 1 }
 0x7cd   :  { %1139 = vsyncpa [#allocation6], 1 }

</bundles_post_ra>
